<compile_context>
chip_gen: v5e
topology: v5e:2x2
jax: 0.10.0
libtpu: 0.0.40
codegen_flags: <defaults>
</compile_context>

<pallas_src>
import functools

import jax
import jax.numpy as jnp
from jax import lax
from jax.experimental import pallas as pl
from jax.experimental.pallas import tpu as pltpu


def _round_up(x, m):
    return (x + m - 1) // m * m


# ---------------------------------------------------------------------------
# Kernels
# ---------------------------------------------------------------------------
def _lista_resident_kernel(w_ref, theta_ref, zx0_ref, out_ref, zx_ref, *,
                           n_layers, m_pad):
    """All LISTA layers for one batch tile; weight stack resident in VMEM.

    w_ref     : (L, K, M_pad)  bf16  stacked [W1 | 0 | W2]^T per layer (resident)
    theta_ref : (L, 1, M_pad)  f32   per-layer threshold rows (resident)
    zx0_ref   : (TB, K)        f32   initial [Z0^T | 0 | X^T] batch tile
    out_ref   : (L, TB, M_pad) f32   per-layer Z^T tiles
    zx_ref    : (TB, K)        f32   VMEM scratch carrying [Z^T | X^T]
    """
    zx_ref[...] = zx0_ref[...]
    for l in range(n_layers):                      # static unroll (small L)
        # Single fused MXU matmul: bf16 x bf16 -> f32 accumulation.
        pre = jnp.dot(zx_ref[...].astype(jnp.bfloat16), w_ref[l],
                      preferred_element_type=jnp.float32)
        theta = theta_ref[l]                       # (1, M_pad) row
        shrunk = jnp.maximum(jnp.abs(pre) - theta, 0.0)
        # sign(pre) * max(|pre| - theta, 0) with exact sign(0) == 0 semantics
        # (also keeps the zero-padded M lanes exactly 0 across layers).
        z_new = jnp.where(pre > 0.0, shrunk,
                          jnp.where(pre < 0.0, -shrunk, 0.0))
        zx_ref[:, :m_pad] = z_new                  # lane-tile-aligned store
        out_ref[l] = z_new


def _lista_streaming_kernel(w_ref, theta_ref, zx0_ref, out_ref, zx_ref, *,
                            m_pad):
    """Fallback: one grid step = one layer on one batch tile (weights streamed).

    w_ref     : (K, M_pad)   bf16 layer-l weight (leading dim squeezed)
    theta_ref : (1, M_pad)   f32
    zx0_ref   : (TB, K)      f32
    out_ref   : (TB, M_pad)  f32
    zx_ref    : (TB, K)      f32 scratch, persists across the layer axis
    """
    layer = pl.program_id(1)

    @pl.when(layer == 0)
    def _():
        zx_ref[...] = zx0_ref[...]

    pre = jnp.dot(zx_ref[...].astype(jnp.bfloat16), w_ref[...],
                  preferred_element_type=jnp.float32)
    theta = theta_ref[...]
    shrunk = jnp.maximum(jnp.abs(pre) - theta, 0.0)
    z_new = jnp.where(pre > 0.0, shrunk,
                      jnp.where(pre < 0.0, -shrunk, 0.0))
    zx_ref[:, :m_pad] = z_new
    out_ref[...] = z_new


# ---------------------------------------------------------------------------
# Wrapper
# ---------------------------------------------------------------------------
def lista_forward_fused(w_stacked, theta_rows, z0, xs, *, n_layers, m, m_pad,
                        n_pad, batch_tile=None):
    """Run all LISTA layers in one pallas_call.

    w_stacked : (L, K, M_pad) bf16, K = M_pad + N_pad
    theta_rows: (L, 1, M_pad) f32
    z0        : (M, B) f32,  xs : (N, B) f32 (already scaled by 100)
    returns   : (L, B, M) f32 per-layer Z^T
    """
    n, b = xs.shape
    k = m_pad + n_pad

    # ---- batch tiling -------------------------------------------------------
    b8 = _round_up(b, 8)
    if batch_tile is not None:
        tb = max(8, _round_up(min(batch_tile, b8), 8))
    else:
        tb = min(256, b8)                          # fill the MXU rows
        # Prefer >=2 batch blocks so the "parallel" axis can shard across the
        # two TensorCores of a v7x chip (tile stays a multiple of 8).
        while (b8 + tb - 1) // tb < 2 and tb > 8:
            tb = max(8, _round_up(tb // 2, 8))
    b_pad = _round_up(b, tb)
    n_b_blocks = b_pad // tb

    # ---- padded [Z0^T | 0 | X^T] --------------------------------------------
    zx0 = jnp.zeros((b_pad, k), jnp.float32)
    zx0 = zx0.at[:b, :m].set(z0.T)
    zx0 = zx0.at[:b, m_pad:m_pad + n].set(xs.T)

    # ---- VMEM budgeting ------------------------------------------------------
    w_bytes = w_stacked.dtype.itemsize
    resident_bytes = (2 * n_layers * k * m_pad * w_bytes       # weight stack
                      + 2 * n_layers * m_pad * 4               # theta rows
                      + 3 * tb * k * 4                         # zx0 (x2) + scratch
                      + 2 * n_layers * tb * m_pad * 4)         # out tiles (x2)
    streaming_bytes = (3 * k * m_pad * w_bytes                 # 3-deep weight bufs
                       + 2 * m_pad * 4
                       + 3 * tb * k * 4
                       + 2 * tb * m_pad * 4)
    vmem_budget = 40 * 1024 * 1024                 # conservative (v7x: 64 MiB)
    resident = resident_bytes <= vmem_budget
    need = resident_bytes if resident else streaming_bytes
    vmem_limit_bytes = int(min(max(2 * need, 32 * 1024 * 1024),
                               48 * 1024 * 1024))

    out_shape = jax.ShapeDtypeStruct((n_layers, b_pad, m_pad), jnp.float32)

    if resident:
        kernel = functools.partial(_lista_resident_kernel,
                                   n_layers=n_layers, m_pad=m_pad)
        z_all = pl.pallas_call(
            kernel,
            out_shape=out_shape,
            grid_spec=pltpu.PrefetchScalarGridSpec(
                num_scalar_prefetch=0,
                grid=(n_b_blocks,),
                in_specs=[
                    # Whole weight / theta stacks, constant block index ->
                    # DMA'd from HBM once, resident across all batch blocks.
                    pl.BlockSpec((n_layers, k, m_pad), lambda bb: (0, 0, 0)),
                    pl.BlockSpec((n_layers, 1, m_pad), lambda bb: (0, 0, 0)),
                    pl.BlockSpec((tb, k), lambda bb: (bb, 0)),
                ],
                out_specs=pl.BlockSpec((n_layers, tb, m_pad),
                                       lambda bb: (0, bb, 0)),
                scratch_shapes=[pltpu.VMEM((tb, k), jnp.float32)],
            ),
            compiler_params=pltpu.CompilerParams(
                dimension_semantics=("parallel",),
                vmem_limit_bytes=vmem_limit_bytes),
        )(w_stacked, theta_rows, zx0)
    else:
        kernel = functools.partial(_lista_streaming_kernel, m_pad=m_pad)
        z_all = pl.pallas_call(
            kernel,
            out_shape=out_shape,
            grid_spec=pltpu.PrefetchScalarGridSpec(
                num_scalar_prefetch=0,
                grid=(n_b_blocks, n_layers),       # layer axis innermost
                in_specs=[
                    pl.BlockSpec((pl.Squeezed(), k, m_pad),
                                 lambda bb, l: (l, 0, 0),
                                 pipeline_mode=pl.Buffered(3)),
                    pl.BlockSpec((pl.Squeezed(), 1, m_pad),
                                 lambda bb, l: (l, 0, 0)),
                    pl.BlockSpec((tb, k), lambda bb, l: (bb, 0)),
                ],
                out_specs=pl.BlockSpec((pl.Squeezed(), tb, m_pad),
                                       lambda bb, l: (l, bb, 0)),
                scratch_shapes=[pltpu.VMEM((tb, k), jnp.float32)],
            ),
            compiler_params=pltpu.CompilerParams(
                dimension_semantics=("parallel", "arbitrary"),
                vmem_limit_bytes=vmem_limit_bytes),
        )(w_stacked, theta_rows, zx0)

    return z_all[:, :b, :m]


# ---------------------------------------------------------------------------
# Module
# ---------------------------------------------------------------------------
class LISTA:
    """JAX/Pallas port of the PyTorch LISTA module (noisyOuts=False path)."""

    def __init__(self, nLayers, N, M, sigma=0.01, key=None):
        self.M = M
        self.N = N
        self.nLayers = nLayers
        self.sigma = sigma
        if key is None:
            key = jax.random.PRNGKey(42)
        self.layers = []
        for _ in range(nLayers):
            key, k1, k2, k3 = jax.random.split(key, 4)
            self.layers.append({
                "W1": jax.random.normal(k1, (M, M), jnp.float32) * sigma,
                "W2": jax.random.normal(k2, (M, N), jnp.float32) * sigma,
                "theta": jax.random.normal(k3, (M, 1), jnp.float32) * sigma,
            })

        # Kernel-friendly, lane-padded parameter stacks (precomputed once).
        self.M_pad = _round_up(M, 128)     # lane-dense Z / output lanes
        self.N_pad = _round_up(N, 16)      # clean bf16 sublane tiling of K
        self.K = self.M_pad + self.N_pad
        w_list, th_list = [], []
        for lyr in self.layers:
            w = jnp.zeros((self.K, self.M_pad), jnp.float32)
            w = w.at[:M, :M].set(lyr["W1"].T)
            w = w.at[self.M_pad:self.M_pad + N, :M].set(lyr["W2"].T)
            w_list.append(w)
            th = jnp.zeros((1, self.M_pad), jnp.float32)
            th = th.at[0, :M].set(lyr["theta"][:, 0])
            th_list.append(th)
        # bf16 weights: native MXU rate, half the HBM bytes streamed.
        self.w_stacked = jnp.stack(w_list).astype(jnp.bfloat16)  # (L, K, M_pad)
        self.theta_rows = jnp.stack(th_list)                     # (L, 1, M_pad)

    def forward(self, X, *, z_init_key, SysID=None, noisyOuts=False,
                batch_tile=None):
        if noisyOuts:
            # TODO(synk): noisyOuts branch needs the jacobian of
            # objective_function (torch.autograd.functional.jacobian); only
            # the default noisyOuts=False path is implemented.
            raise NotImplementedError("noisyOuts=True not implemented")
        Xs = 100.0 * X.astype(jnp.float32)                        # (N, B)
        B = Xs.shape[1]
        Z0 = jax.random.normal(z_init_key, (self.M, B), jnp.float32)
        outs = {0: Z0}                                            # raw init (as in torch)
        z_all = lista_forward_fused(
            self.w_stacked, self.theta_rows, Z0, Xs,
            n_layers=self.nLayers, m=self.M, m_pad=self.M_pad,
            n_pad=self.N_pad, batch_tile=batch_tile)              # (L, B, M)
        for l in range(self.nLayers):
            outs[l + 1] = z_all[l].T / 100.0
        return outs[self.nLayers], outs


def _reference_forward(model, X, z_init_key):
    """Pure-JAX f32 reference mirroring the PyTorch forward (noisyOuts=False)."""
    Xs = 100.0 * X.astype(jnp.float32)
    Z = jax.random.normal(z_init_key, (model.M, Xs.shape[1]), jnp.float32)
    outs = {0: Z}
    for l in range(model.nLayers):
        W1 = model.layers[l]["W1"]
        W2 = model.layers[l]["W2"]
        theta = model.layers[l]["theta"]
        pre = (jnp.dot(W1, Z, precision=lax.Precision.HIGHEST)
               + jnp.dot(W2, Xs, precision=lax.Precision.HIGHEST))
        Z = jnp.sign(pre) * jnp.maximum(jnp.abs(pre) - theta, 0.0)
        outs[l + 1] = Z / 100.0
    return Z / 100.0, outs


if __name__ == "__main__":
    key = jax.random.PRNGKey(0)
    kx, kz, kparams = jax.random.split(key, 3)

    # Small, module-consistent shapes: M (code dim) = 32, N (obs dim) = 16,
    # batch B = 8, 3 unrolled layers.
    nLayers, N, M, B = 3, 16, 32, 8

    model = LISTA(nLayers, N, M, sigma=0.01, key=kparams)
    X = jax.random.normal(kx, (N, B), jnp.float32)

    Z_out, outs = model.forward(X, z_init_key=kz)
    Z_out = jax.block_until_ready(Z_out)

    Z_ref, outs_ref = _reference_forward(model, X, kz)
    assert Z_out.shape == (M, B)
    assert len(outs) == nLayers + 1
    # bf16 MXU operands vs. an f32-HIGHEST reference -> loosened tolerances.
    assert jnp.allclose(Z_out, Z_ref, atol=5e-3, rtol=5e-2), float(
        jnp.max(jnp.abs(Z_out - Z_ref)))
    for l in range(1, nLayers + 1):
        assert jnp.allclose(outs[l], outs_ref[l], atol=5e-3, rtol=5e-2)

    print("KERNEL_OK")
</pallas_src>

<mosaic_0001>
module attributes {stable_mosaic.version = 11 : i64} {
  func.func @_lista_resident_kernel(%arg0: i32, %arg1: memref<3x144x128xbf16, #tpu.memory_space<vmem>>, %arg2: memref<3x1x128xf32, #tpu.memory_space<vmem>>, %arg3: memref<8x144xf32, #tpu.memory_space<vmem>>, %arg4: memref<3x8x128xf32, #tpu.memory_space<vmem>>, %arg5: memref<8x144xf32, #tpu.memory_space<vmem>>) attributes {dimension_semantics = [#tpu.dimension_semantics<parallel>], iteration_bounds = array<i64: 1>, scalar_prefetch = 0 : i64, scratch_operands = 1 : i64, tpu.core_type = #tpu.core_type<tc>, window_params = [{pipeline_mode = #tpu.pipeline_mode<synchronous>, transform_indices = @transform_0, window_bounds = array<i64: 3, 144, 128>}, {pipeline_mode = #tpu.pipeline_mode<synchronous>, transform_indices = @transform_1, window_bounds = array<i64: 3, 1, 128>}, {transform_indices = @transform_2, window_bounds = array<i64: 8, 144>}, {transform_indices = @transform_3, window_bounds = array<i64: 3, 8, 128>}]} {
    %c0 = arith.constant 0 : index
    %c0_0 = arith.constant 0 : index
    %0 = vector.load %arg3[%c0, %c0_0] : memref<8x144xf32, #tpu.memory_space<vmem>>, vector<8x144xf32>
    %c0_1 = arith.constant 0 : index
    %c0_2 = arith.constant 0 : index
    %1 = vector.load %arg5[%c0_1, %c0_2] : memref<8x144xf32, #tpu.memory_space<vmem>>, vector<8x144xf32>
    tpu.vector_store %arg5[%c0_1, %c0_2], %0 {strides = array<i32>} : memref<8x144xf32, #tpu.memory_space<vmem>>, vector<8x144xf32>,
    %c0_3 = arith.constant 0 : index
    %c0_4 = arith.constant 0 : index
    %2 = vector.load %arg5[%c0_3, %c0_4] : memref<8x144xf32, #tpu.memory_space<vmem>>, vector<8x144xf32>
    %3 = arith.truncf %2 : vector<8x144xf32> to vector<8x144xbf16>
    %c0_5 = arith.constant 0 : index
    %c0_6 = arith.constant 0 : index
    %c0_7 = arith.constant 0 : index
    %4 = vector.load %arg1[%c0_5, %c0_6, %c0_7] : memref<3x144x128xbf16, #tpu.memory_space<vmem>>, vector<1x144x128xbf16>
    %5 = vector.shape_cast %4 : vector<1x144x128xbf16> to vector<144x128xbf16>
    %cst = arith.constant dense<0.000000e+00> : vector<8x128xf32>
    %6 = tpu.matmul %3, %5, %cst {dimension_numbers = #tpu.dot_dimension_numbers<[1], [0], [0], [1], [0, 0, 1, 1], [], []>} : vector<8x144xbf16>, vector<144x128xbf16>, vector<8x128xf32> -> vector<8x128xf32>
    %c0_8 = arith.constant 0 : index
    %c0_9 = arith.constant 0 : index
    %c0_10 = arith.constant 0 : index
    %7 = vector.load %arg2[%c0_8, %c0_9, %c0_10] : memref<3x1x128xf32, #tpu.memory_space<vmem>>, vector<1x1x128xf32>
    %8 = vector.shape_cast %7 : vector<1x1x128xf32> to vector<1x128xf32>
    %9 = math.absf %6 : vector<8x128xf32>
    %10 = vector.broadcast %8 : vector<1x128xf32> to vector<8x128xf32>
    %11 = arith.subf %9, %10 : vector<8x128xf32>
    %cst_11 = arith.constant 0.000000e+00 : f32
    %12 = vector.broadcast %cst_11 : f32 to vector<8x128xf32>
    %13 = arith.maximumf %11, %12 : vector<8x128xf32>
    %cst_12 = arith.constant 0.000000e+00 : f32
    %14 = vector.broadcast %cst_12 : f32 to vector<8x128xf32>
    %15 = arith.cmpf ogt, %6, %14 : vector<8x128xf32>
    %cst_13 = arith.constant 0.000000e+00 : f32
    %16 = vector.broadcast %cst_13 : f32 to vector<8x128xf32>
    %17 = arith.cmpf olt, %6, %16 : vector<8x128xf32>
    %cst_14 = arith.constant 0.000000e+00 : f32
    %18 = vector.broadcast %cst_14 : f32 to vector<8x128xf32>
    %19 = arith.subf %18, %13 : vector<8x128xf32>
    %cst_15 = arith.constant 0.000000e+00 : f32
    %20 = vector.broadcast %cst_15 : f32 to vector<8x128xf32>
    %21 = arith.select %17, %19, %20 : vector<8x128xi1>, vector<8x128xf32>
    %22 = arith.select %15, %13, %21 : vector<8x128xi1>, vector<8x128xf32>
    %c0_16 = arith.constant 0 : index
    %c0_17 = arith.constant 0 : index
    %23 = vector.load %arg5[%c0_16, %c0_17] : memref<8x144xf32, #tpu.memory_space<vmem>>, vector<8x128xf32>
    tpu.vector_store %arg5[%c0_16, %c0_17], %22 {strides = array<i32>} : memref<8x144xf32, #tpu.memory_space<vmem>>, vector<8x128xf32>,
    %c0_18 = arith.constant 0 : index
    %c0_19 = arith.constant 0 : index
    %c0_20 = arith.constant 0 : index
    %24 = vector.load %arg4[%c0_18, %c0_19, %c0_20] : memref<3x8x128xf32, #tpu.memory_space<vmem>>, vector<1x8x128xf32>
    %25 = vector.shape_cast %24 : vector<1x8x128xf32> to vector<8x128xf32>
    %26 = vector.shape_cast %22 : vector<8x128xf32> to vector<1x8x128xf32>
    tpu.vector_store %arg4[%c0_18, %c0_19, %c0_20], %26 {strides = array<i32>} : memref<3x8x128xf32, #tpu.memory_space<vmem>>, vector<1x8x128xf32>,
    %c0_21 = arith.constant 0 : index
    %c0_22 = arith.constant 0 : index
    %27 = vector.load %arg5[%c0_21, %c0_22] : memref<8x144xf32, #tpu.memory_space<vmem>>, vector<8x144xf32>
    %28 = arith.truncf %27 : vector<8x144xf32> to vector<8x144xbf16>
    %c1 = arith.constant 1 : index
    %c0_23 = arith.constant 0 : index
    %c0_24 = arith.constant 0 : index
    %29 = vector.load %arg1[%c1, %c0_23, %c0_24] : memref<3x144x128xbf16, #tpu.memory_space<vmem>>, vector<1x144x128xbf16>
    %30 = vector.shape_cast %29 : vector<1x144x128xbf16> to vector<144x128xbf16>
    %cst_25 = arith.constant dense<0.000000e+00> : vector<8x128xf32>
    %31 = tpu.matmul %28, %30, %cst_25 {dimension_numbers = #tpu.dot_dimension_numbers<[1], [0], [0], [1], [0, 0, 1, 1], [], []>} : vector<8x144xbf16>, vector<144x128xbf16>, vector<8x128xf32> -> vector<8x128xf32>
    %c1_26 = arith.constant 1 : index
    %c0_27 = arith.constant 0 : index
    %c0_28 = arith.constant 0 : index
    %32 = vector.load %arg2[%c1_26, %c0_27, %c0_28] : memref<3x1x128xf32, #tpu.memory_space<vmem>>, vector<1x1x128xf32>
    %33 = vector.shape_cast %32 : vector<1x1x128xf32> to vector<1x128xf32>
    %34 = math.absf %31 : vector<8x128xf32>
    %35 = vector.broadcast %33 : vector<1x128xf32> to vector<8x128xf32>
    %36 = arith.subf %34, %35 : vector<8x128xf32>
    %cst_29 = arith.constant 0.000000e+00 : f32
    %37 = vector.broadcast %cst_29 : f32 to vector<8x128xf32>
    %38 = arith.maximumf %36, %37 : vector<8x128xf32>
    %cst_30 = arith.constant 0.000000e+00 : f32
    %39 = vector.broadcast %cst_30 : f32 to vector<8x128xf32>
    %40 = arith.cmpf ogt, %31, %39 : vector<8x128xf32>
    %cst_31 = arith.constant 0.000000e+00 : f32
    %41 = vector.broadcast %cst_31 : f32 to vector<8x128xf32>
    %42 = arith.cmpf olt, %31, %41 : vector<8x128xf32>
    %cst_32 = arith.constant 0.000000e+00 : f32
    %43 = vector.broadcast %cst_32 : f32 to vector<8x128xf32>
    %44 = arith.subf %43, %38 : vector<8x128xf32>
    %cst_33 = arith.constant 0.000000e+00 : f32
    %45 = vector.broadcast %cst_33 : f32 to vector<8x128xf32>
    %46 = arith.select %42, %44, %45 : vector<8x128xi1>, vector<8x128xf32>
    %47 = arith.select %40, %38, %46 : vector<8x128xi1>, vector<8x128xf32>
    %c0_34 = arith.constant 0 : index
    %c0_35 = arith.constant 0 : index
    %48 = vector.load %arg5[%c0_34, %c0_35] : memref<8x144xf32, #tpu.memory_space<vmem>>, vector<8x128xf32>
    tpu.vector_store %arg5[%c0_34, %c0_35], %47 {strides = array<i32>} : memref<8x144xf32, #tpu.memory_space<vmem>>, vector<8x128xf32>,
    %c1_36 = arith.constant 1 : index
    %c0_37 = arith.constant 0 : index
    %c0_38 = arith.constant 0 : index
    %49 = vector.load %arg4[%c1_36, %c0_37, %c0_38] : memref<3x8x128xf32, #tpu.memory_space<vmem>>, vector<1x8x128xf32>
    %50 = vector.shape_cast %49 : vector<1x8x128xf32> to vector<8x128xf32>
    %51 = vector.shape_cast %47 : vector<8x128xf32> to vector<1x8x128xf32>
    tpu.vector_store %arg4[%c1_36, %c0_37, %c0_38], %51 {strides = array<i32>} : memref<3x8x128xf32, #tpu.memory_space<vmem>>, vector<1x8x128xf32>,
    %c0_39 = arith.constant 0 : index
    %c0_40 = arith.constant 0 : index
    %52 = vector.load %arg5[%c0_39, %c0_40] : memref<8x144xf32, #tpu.memory_space<vmem>>, vector<8x144xf32>
    %53 = arith.truncf %52 : vector<8x144xf32> to vector<8x144xbf16>
    %c2 = arith.constant 2 : index
    %c0_41 = arith.constant 0 : index
    %c0_42 = arith.constant 0 : index
    %54 = vector.load %arg1[%c2, %c0_41, %c0_42] : memref<3x144x128xbf16, #tpu.memory_space<vmem>>, vector<1x144x128xbf16>
    %55 = vector.shape_cast %54 : vector<1x144x128xbf16> to vector<144x128xbf16>
    %cst_43 = arith.constant dense<0.000000e+00> : vector<8x128xf32>
    %56 = tpu.matmul %53, %55, %cst_43 {dimension_numbers = #tpu.dot_dimension_numbers<[1], [0], [0], [1], [0, 0, 1, 1], [], []>} : vector<8x144xbf16>, vector<144x128xbf16>, vector<8x128xf32> -> vector<8x128xf32>
    %c2_44 = arith.constant 2 : index
    %c0_45 = arith.constant 0 : index
    %c0_46 = arith.constant 0 : index
    %57 = vector.load %arg2[%c2_44, %c0_45, %c0_46] : memref<3x1x128xf32, #tpu.memory_space<vmem>>, vector<1x1x128xf32>
    %58 = vector.shape_cast %57 : vector<1x1x128xf32> to vector<1x128xf32>
    %59 = math.absf %56 : vector<8x128xf32>
    %60 = vector.broadcast %58 : vector<1x128xf32> to vector<8x128xf32>
    %61 = arith.subf %59, %60 : vector<8x128xf32>
    %cst_47 = arith.constant 0.000000e+00 : f32
    %62 = vector.broadcast %cst_47 : f32 to vector<8x128xf32>
    %63 = arith.maximumf %61, %62 : vector<8x128xf32>
    %cst_48 = arith.constant 0.000000e+00 : f32
    %64 = vector.broadcast %cst_48 : f32 to vector<8x128xf32>
    %65 = arith.cmpf ogt, %56, %64 : vector<8x128xf32>
    %cst_49 = arith.constant 0.000000e+00 : f32
    %66 = vector.broadcast %cst_49 : f32 to vector<8x128xf32>
    %67 = arith.cmpf olt, %56, %66 : vector<8x128xf32>
    %cst_50 = arith.constant 0.000000e+00 : f32
    %68 = vector.broadcast %cst_50 : f32 to vector<8x128xf32>
    %69 = arith.subf %68, %63 : vector<8x128xf32>
    %cst_51 = arith.constant 0.000000e+00 : f32
    %70 = vector.broadcast %cst_51 : f32 to vector<8x128xf32>
    %71 = arith.select %67, %69, %70 : vector<8x128xi1>, vector<8x128xf32>
    %72 = arith.select %65, %63, %71 : vector<8x128xi1>, vector<8x128xf32>
    %c0_52 = arith.constant 0 : index
    %c0_53 = arith.constant 0 : index
    %73 = vector.load %arg5[%c0_52, %c0_53] : memref<8x144xf32, #tpu.memory_space<vmem>>, vector<8x128xf32>
    tpu.vector_store %arg5[%c0_52, %c0_53], %72 {strides = array<i32>} : memref<8x144xf32, #tpu.memory_space<vmem>>, vector<8x128xf32>,
    %c2_54 = arith.constant 2 : index
    %c0_55 = arith.constant 0 : index
    %c0_56 = arith.constant 0 : index
    %74 = vector.load %arg4[%c2_54, %c0_55, %c0_56] : memref<3x8x128xf32, #tpu.memory_space<vmem>>, vector<1x8x128xf32>
    %75 = vector.shape_cast %74 : vector<1x8x128xf32> to vector<8x128xf32>
    %76 = vector.shape_cast %72 : vector<8x128xf32> to vector<1x8x128xf32>
    tpu.vector_store %arg4[%c2_54, %c0_55, %c0_56], %76 {strides = array<i32>} : memref<3x8x128xf32, #tpu.memory_space<vmem>>, vector<1x8x128xf32>,
    return
  }
  func.func @transform_0(%arg0: i32) -> (i32, i32, i32) {
    %c0_i32 = arith.constant 0 : i32
    %c0_i32_0 = arith.constant 0 : i32
    %c0_i32_1 = arith.constant 0 : i32
    %c0_i32_2 = arith.constant 0 : i32
    return %c0_i32, %c0_i32_0, %c0_i32_1 : i32, i32, i32
  }
  func.func @transform_1(%arg0: i32) -> (i32, i32, i32) {
    %c0_i32 = arith.constant 0 : i32
    %c0_i32_0 = arith.constant 0 : i32
    %c0_i32_1 = arith.constant 0 : i32
    %c0_i32_2 = arith.constant 0 : i32
    return %c0_i32, %c0_i32_0, %c0_i32_1 : i32, i32, i32
  }
  func.func @transform_2(%arg0: i32) -> (i32, i32) {
    %c0_i32 = arith.constant 0 : i32
    %c0_i32_0 = arith.constant 0 : i32
    return %arg0, %c0_i32 : i32, i32
  }
  func.func @transform_3(%arg0: i32) -> (i32, i32, i32) {
    %c0_i32 = arith.constant 0 : i32
    %c0_i32_0 = arith.constant 0 : i32
    %c0_i32_1 = arith.constant 0 : i32
    return %c0_i32, %arg0, %c0_i32_0 : i32, i32, i32
  }
}

</mosaic_0001>

<bundles_post_ra>
// kernel: tpu_custom_call.1
= control target key start
LH: loop header
LB: loop body
LE: loop exit
PB: predicated region body
PF: predicated region fallthrough
CT: control target
= control target key end

     0   :  { %8 = vsyncpa [#allocation4], 0  ;;  %s753_s0 = inlined_call_operand.hbm [shape: bf16[3,144,128], index: 0, kind: input, shape index: {}]   ;;  %s754_s1 = inlined_call_operand.hbm [shape: f32[3,1,128], index: 1, kind: input, shape index: {}]   ;;  %s755_s2 = inlined_call_operand.hbm [shape: f32[8,144], index: 2, kind: input, shape index: {}]   ;;  %s756_s3 = inlined_call_operand.hbm [shape: f32[3,8,128], index: 3, kind: output, shape index: {}]  }
   0x1   :  { %9 = vsyncpa [#allocation7], 0  ;;  %s28_s14 = sshll.u32 %s754_s1, 4  ;;  %s29_s14 = int_to_ptr.hbm [resolvable:$true] %s28_s14 }
   0x2   :  { %10 = vsyncpa [#allocation5], 0  ;;  %s702_s15 = smov [#allocation6]   ;;  %s15_s19 = sshll.u32 %s753_s0, 4  ;;  %s16_s19 = int_to_ptr.hbm [resolvable:$true] %s15_s19 }
   0x3   :  { %s30_s16 = sshll.u32 %s702_s15, 4  ;;  %s703_s20 = smov 16   ;;  %s31_s16 = int_to_ptr.vmem [resolvable:$true] %s30_s16 }
   0x4   :  { %s704_s21 = smov 1   ;;  %s705_s22 = smov [#allocation3]  }
   0x5   :  { %36 = dma.hbm_to_vmem [thread:$0]  %s29_s14, 48, %s31_s16, [#allocation7], %s703_s20, %s703_s20, %s704_s21  }
   0x6   :  { %s17_s23 = sshll.u32 %s705_s22, 4  ;;  %s706_s24 = smov 64   ;;  %s18_s23 = int_to_ptr.vmem [resolvable:$true] %s17_s23 }
   0x7   :  { %s707_s25 = smov 4   ;;  %s42_s27 = sshll.u32 %s755_s2, 4  ;;  %s43_s27 = int_to_ptr.hbm [resolvable:$true] %s42_s27 }
   0x8   :  { %23 = dma.hbm_to_vmem [thread:$0]  %s16_s19, 3456, %s18_s23, [#allocation4], %s706_s24, %s706_s24, %s707_s25  }
   0x9   :  { %s708_s28 = smov [#allocation8]  }
   0xa   :  { %s44_s29 = sshll.u32 %s708_s28, 4  ;;  %s45_s29 = int_to_ptr.vmem [resolvable:$true] %s44_s29 }
   0xb   :  { %47 = dma.hbm_to_vmem [thread:$0]  %s43_s27, 256, %s45_s29, [#allocation7]  }
   0xc   :  { %696 = dma.done.wait [#allocation4], 3456  }
   0xd   :  { %697 = vsyncadd [#allocation4], 4294963840 }
   0xe   :  { %698 = dma.done.wait [#allocation7], 304  }
   0xf   :  { %699 = vsyncadd [#allocation7], 4294966992  ;;  %v567_v0 = vld [vmem:[#allocation3 + $0x38] sm:$0xff]  ;;  %vm64_vm0 = vcmask 130048   ;;  %v566_v1 = vld [vmem:[#allocation3 + $0x30] sm:$0xff]  ;;  %s709_s0 = smov [#allocation9]  }
  0x10   :  { %145 = vmatpush.bf16.msra.mxu0 %v567_v0  ;;  %v568_v2 = vld [vmem:[#allocation3 + $0x40] sm:$0xff]  ;;  %v565_v4 = vld [vmem:[#allocation3 + $0x28] sm:$0xff]  ;;  %v563_v8 = vld [vmem:[#allocation3 + $0x18] sm:$0xff]  ;;  %s433_s2 = sshll.u32 %s709_s0, 4  ;;  %s435_s5 = sshll.u32 %s756_s3, 4  ;;  %s434_s2 = int_to_ptr.vmem [resolvable:$true] %s433_s2  ;;  %s436_s5 = int_to_ptr.hbm [resolvable:$true] %s435_s5 }
  0x11   :  { %v62_v3 = vld [vmem:[#allocation8 + $0x8] sm:$0xff]  ;;  %165 = vmatpush.bf16.msra.mxu1 %v568_v2  ;;  %v562_v9 = vld [vmem:[#allocation3 + $0x10] sm:$0xff]  ;;  %v61_v12 = vld [vmem:[#allocation8] sm:$0xff]  ;;  %s710_s6 = smov 128   ;;  %s711_s7 = smov 8  }
  0x12   :  { %65 = vst.msk [vmem:[#allocation2 + $0x8] sm:$0xff] %vm64_vm0, %v62_v3  ;;  %v564_v5 = vld [vmem:[#allocation3 + $0x20] sm:$0xff]  ;;  %v561_v10 = vld [vmem:[#allocation3 + $0x8] sm:$0xff]  ;;  %v68_v13 = vpack.c.bf16 %v61_v12, %v61_v12  ;;  %v575_v15 = vld [vmem:[#allocation3 + $0x78] sm:$0xff] }
  0x13   :  { %v560_v11 = vld [vmem:[#allocation3] sm:$0xff]  ;;  %v574_v16 = vld [vmem:[#allocation3 + $0x70] sm:$0xff]  ;;  %v573_v17 = vld [vmem:[#allocation3 + $0x68] sm:$0xff] }
  0x14   :  { %146 = vmatpush.bf16.msra.mxu0 %v566_v1  ;;  %v576_v14 = vld [vmem:[#allocation3 + $0x80] sm:$0xff]  ;;  %v571_v19 = vld [vmem:[#allocation3 + $0x58] sm:$0xff]  ;;  %v577_v20 = vld [vmem:[#allocation3 + $0x88] sm:$0xff] }
  0x15   :  { %265 = vmatpush.bf16.msra.mxu2 %v576_v14  ;;  %v572_v18 = vld [vmem:[#allocation3 + $0x60] sm:$0xff]  ;;  %285 = vmatpush.bf16.msra.mxu3 %v577_v20  ;;  %v570_v21 = vld [vmem:[#allocation3 + $0x50] sm:$0xff]  ;;  %v569_v22 = vld [vmem:[#allocation3 + $0x48] sm:$0xff] }
  0x16   :  { %v597_v27 = vld [vmem:[#allocation6] ss:$0 sm:$0xff]  ;;  %v585_v36 = vld [vmem:[#allocation3 + $0xc8] sm:$0xff]  ;;  %v584_v37 = vld [vmem:[#allocation3 + $0xc0] sm:$0xff] }
  0x17   :  { %387 = vmatpush.bf16.msrb.mxu1 %v585_v36  ;;  %v583_v38 = vld [vmem:[#allocation3 + $0xb8] sm:$0xff]  ;;  %v582_v40 = vld [vmem:[#allocation3 + $0xb0] sm:$0xff]  ;;  %v581_v42 = vld [vmem:[#allocation3 + $0xa8] sm:$0xff] }
  0x18   :  { %147 = vmatpush.bf16.msra.mxu0 %v565_v4  ;;  %v586_v41 = vld [vmem:[#allocation3 + $0xd0] sm:$0xff]  ;;  %v580_v44 = vld [vmem:[#allocation3 + $0xa0] sm:$0xff]  ;;  %v579_v45 = vld [vmem:[#allocation3 + $0x98] sm:$0xff] }
  0x19   :  { %v67_v6 = vld [vmem:[#allocation2 + $0x8] sm:$0xff]  ;;  %266 = vmatpush.bf16.msra.mxu2 %v575_v15  ;;  %407 = vmatpush.bf16.msrb.mxu3 %v586_v41  ;;  %v578_v46 = vld [vmem:[#allocation3 + $0x90] sm:$0xff] }
  0x1a   :  { %v742_v7 = vpack.c.bf16 %v67_v6, %v67_v6  ;;  %v598_v49 = vld [vmem:[#allocation6 + $0x1] ss:$0 sm:$0xff]  ;;  %v599_v62 = vld [vmem:[#allocation6 + $0x2] ss:$0 sm:$0xff] }
  0x1b   :  { %388 = vmatpush.bf16.msrb.mxu1 %v584_v37 }
  0x1c   :  { %485 = vmatmul.msk.bf16.vlgmr.msra.gmra.mxu1 %vm64_vm0, %v742_v7  ;;  %148 = vmatpush.bf16.msra.mxu0 %v564_v5 }
  0x1d   :  { %267 = vmatpush.bf16.msra.mxu2 %v574_v16  ;;  %522 = vmatmul.msk.bf16.vlgmr.msra.gmra.mxu3 %vm64_vm0, %v742_v7 }
  0x1f   :  { %389 = vmatpush.bf16.msrb.mxu1 %v583_v38 }
  0x20   :  { %149 = vmatpush.bf16.msra.mxu0 %v563_v8 }
  0x21   :  { %268 = vmatpush.bf16.msra.mxu2 %v573_v17 }
  0x23   :  { %390 = vmatpush.bf16.msrb.mxu1 %v582_v40 }
  0x24   :  { %150 = vmatpush.bf16.msra.mxu0 %v562_v9 }
  0x25   :  { %269 = vmatpush.bf16.msra.mxu2 %v572_v18 }
  0x27   :  { %391 = vmatpush.bf16.msrb.mxu1 %v581_v42 }
  0x28   :  { %151 = vmatpush.bf16.msra.mxu0 %v561_v10 }
  0x29   :  { %270 = vmatpush.bf16.msra.mxu2 %v571_v19 }
  0x2b   :  { %392 = vmatpush.bf16.msrb.mxu1 %v580_v44 }
  0x2c   :  { %152 = vmatpush.bf16.msra.mxu0 %v560_v11 }
  0x2d   :  { %271 = vmatpush.bf16.msra.mxu2 %v570_v21  ;;  %559 = vmatmul.msk.bf16.vlgmr.msrb.gmra.mxu3 %vm64_vm0, %v742_v7 }
  0x2f   :  { %153 = vmatmul.bf16.vlgmr.msra.gmra.mxu0 %v68_v13  ;;  %393 = vmatpush.bf16.msrb.mxu1 %v579_v45 }
  0x31   :  { %272 = vmatpush.bf16.msra.mxu2 %v569_v22 }
  0x33   :  { %394 = vmatpush.bf16.msrb.mxu1 %v578_v46 }
  0x99   :  { %v167_v23 = vpop.f32.mrf.mxu1 }
  0xa0   :  { %v287_v39 = vpop.f32.mrf.mxu3 }
  0xa1   :  { %v169_v24 = vpop.f32.mrf.mxu1 }
  0xa8   :  { %v289_v43 = vpop.f32.mrf.mxu3 }
  0xac   :  { %v154_v25 = vpop.f32.mrf.mxu0 }
  0xad   :  { %v168_v26 = vadd.f32 %v167_v23, %v154_v25 }
  0xaf   :  { %v172_v28 = vand.u32 2147483647, %v168_v26  ;;  %vm179_vm1 = vcmp.lt.f32.partialorder %v168_v26, 0.0  ;;  %vm178_vm2 = vcmp.gt.f32.partialorder %v168_v26, 0.0 }
  0xb0   :  { %v409_v58 = vpop.f32.mrf.mxu3 }
  0xb1   :  { %v176_v29 = vsub.f32 %v172_v28, %v597_v27 }
  0xb3   :  { %v177_v30 = vmax.f32 %v176_v29, 0.0 }
  0xb4   :  { %v156_v31 = vpop.f32.mrf.mxu0 }
  0xb5   :  { %v180_v32 = vsub.f32 0.0, %v177_v30 }
  0xb7   :  { %v181_v33 = vsel %vm179_vm1, %v180_v32, 0.0 }
  0xb8   :  { %v182_v34 = vsel %vm178_vm2, %v177_v30, %v181_v33  ;;  %v411_v59 = vpop.f32.mrf.mxu3 }
  0xb9   :  { %184 = vst [vmem:[#allocation9] sm:$0xff] %v182_v34  ;;  %v187_v35 = vpack.c.bf16 %v182_v34, %v182_v34 }
  0xbb   :  { %273 = vmatmul.bf16.vlgmr.msra.gmra.mxu2 %v187_v35 }
 0x13e   :  { %v274_v47 = vpop.f32.mrf.mxu2 }
 0x13f   :  { %v288_v48 = vadd.f32 %v287_v39, %v274_v47 }
 0x141   :  { %v293_v50 = vand.u32 2147483647, %v288_v48  ;;  %vm300_vm3 = vcmp.lt.f32.partialorder %v288_v48, 0.0  ;;  %vm299_vm4 = vcmp.gt.f32.partialorder %v288_v48, 0.0 }
 0x143   :  { %v297_v51 = vsub.f32 %v293_v50, %v598_v49 }
 0x145   :  { %v298_v52 = vmax.f32 %v297_v51, 0.0 }
 0x146   :  { %v276_v53 = vpop.f32.mrf.mxu2 }
 0x147   :  { %v301_v54 = vsub.f32 0.0, %v298_v52 }
 0x149   :  { %v302_v55 = vsel %vm300_vm3, %v301_v54, 0.0 }
 0x14a   :  { %v303_v56 = vsel %vm299_vm4, %v298_v52, %v302_v55 }
 0x14b   :  { %306 = vst [vmem:[#allocation9 + $0x8] sm:$0xff] %v303_v56  ;;  %v309_v57 = vpack.c.bf16 %v303_v56, %v303_v56 }
 0x14d   :  { %395 = vmatmul.bf16.vlgmr.msrb.gmra.mxu1 %v309_v57 }
 0x1ca   :  { %v396_v60 = vpop.f32.mrf.mxu1 }
 0x1cb   :  { %v410_v61 = vadd.f32 %v409_v58, %v396_v60 }
 0x1cd   :  { %v415_v63 = vand.u32 2147483647, %v410_v61  ;;  %vm422_vm5 = vcmp.lt.f32.partialorder %v410_v61, 0.0  ;;  %vm421_vm6 = vcmp.gt.f32.partialorder %v410_v61, 0.0 }
 0x1cf   :  { %v419_v0 = vsub.f32 %v415_v63, %v599_v62 }
 0x1d1   :  { %v420_v1 = vmax.f32 %v419_v0, 0.0 }
 0x1d2   :  { %v398_v2 = vpop.f32.mrf.mxu1 }
 0x1d3   :  { %v423_v3 = vsub.f32 0.0, %v420_v1 }
 0x1d5   :  { %v424_v4 = vsel %vm422_vm5, %v423_v3, 0.0 }
 0x1d6   :  { %v425_v5 = vsel %vm421_vm6, %v420_v1, %v424_v4 }
 0x1d7   :  { %428 = vst [vmem:[#allocation9 + $0x10] sm:$0xff] %v425_v5 }
 0x1d8   :  { %441 = dma.vmem_to_hbm [thread:$0]  %s434_s2, 384, %s436_s5, [#allocation5], %s710_s6, %s710_s6, %s711_s7  }
 0x1d9   :  { %700 = dma.done.wait [#allocation5], 384  }
 0x1da   :  { %701 = vsyncadd [#allocation5], 4294966912 }
 0x1db   :  { %446 = vsyncpa [#allocation4], 1 }
 0x1dc   :  { %447 = vsyncpa [#allocation7], 1 }
 0x1dd   :  { %448 = vsyncpa [#allocation5], 1 }

</bundles_post_ra>
